<compile_context>
chip_gen: v6e
topology: v6e:2x2x1
jax: 0.10.0
libtpu: 0.0.40
codegen_flags: <defaults>
</compile_context>

<pallas_src>
import math

import jax
import jax.numpy as jnp
import numpy as np
from jax.experimental import pallas as pl
from jax.experimental.pallas import tpu as pltpu

# ----------------------------- configuration --------------------------------
B, Cin, H, W = 2, 3, 16, 16
Nv = 32

layers_2d = ["conv1", "conv2"]
channels_2d = {"conv1": [0, 2, 4, 5], "conv2": [1, 3]}
res = [(8, 8), (4, 4)]
res_id = {"conv1": 0, "conv2": 1}

layers_1d = ["fc1"]
channels_1d = {"fc1": [0, 1, 2]}

# channel counts produced by the (synthetic) backbone for each tapped layer
FEAT_CHANNELS_2D = {"conv1": 8, "conv2": 6}
FEAT_CHANNELS_1D = {"fc1": 5}


def channel_summer(channels):
    return sum(len(v) for v in channels.values())


N_2d = channel_summer(channels_2d)  # 6
N_1d = channel_summer(channels_1d)  # 3

NV_PAD = ((Nv + 127) // 128) * 128  # lane-dense output width (128)

K1 = FEAT_CHANNELS_2D["conv1"] * res[0][0] * res[0][1]  # 8 * 64  = 512
K2 = FEAT_CHANNELS_2D["conv2"] * res[1][0] * res[1][1]  # 6 * 16  = 96
KFC = FEAT_CHANNELS_1D["fc1"]                           # 5


# --------------------------- parameter init ----------------------------------
def kaiming_uniform(key, shape, a=math.sqrt(5)):
    # mimics torch.nn.init.kaiming_uniform_ fan_in convention
    if len(shape) == 2:
        fan_in = shape[1]
    else:
        fan_in = shape[1] * int(np.prod(shape[2:]))
    gain = math.sqrt(2.0 / (1.0 + a * a))
    bound = gain * math.sqrt(3.0 / fan_in)
    return jax.random.uniform(key, shape, jnp.float32, -bound, bound)


def init_params(key):
    ks = jax.random.split(key, 8)
    params = {
        "rfs": [
            kaiming_uniform(ks[0], res[0] + (Nv,)),
            kaiming_uniform(ks[1], res[1] + (Nv,)),
        ],
        "w_2d": kaiming_uniform(ks[2], (N_2d, Nv)),
        "w_1d": kaiming_uniform(ks[3], (N_1d, Nv)),
        "b": jax.random.uniform(ks[4], (Nv,), jnp.float32, 0.0, 1.0),
        # tiny synthetic backbone weights (not part of the encoder itself)
        "W1": kaiming_uniform(ks[5], (8, Cin)),
        "W2": kaiming_uniform(ks[6], (6, 8)),
        "W3": kaiming_uniform(ks[7], (5, 6)),
    }
    return params


# ------------------------ synthetic backbone (glue) ---------------------------
def backbone(x, params):
    """Stand-in for `self.model(x)`: produces a dict of NCHW / NC features."""
    h1 = jax.nn.relu(jnp.einsum("oc,bchw->bohw", params["W1"], x))   # [B,8,16,16]
    p1 = h1.reshape(B, 8, 8, 2, 8, 2).mean(axis=(3, 5))               # [B,8,8,8]
    h2 = jax.nn.relu(jnp.einsum("oc,bchw->bohw", params["W2"], p1))   # [B,6,8,8]
    p2 = h2.reshape(B, 6, 4, 2, 4, 2).mean(axis=(3, 5))               # [B,6,4,4]
    fc = jnp.einsum("oc,bc->bo", params["W3"], p2.mean(axis=(2, 3)))  # [B,5]
    return {"conv1": p1, "conv2": p2, "fc1": fc}


# ------------------------------ Pallas kernel ---------------------------------
def encoder_kernel(x1_ref, x2_ref, x3_ref, w1_ref, w2_ref, wfc_ref, b_ref,
                   out_ref):
    # Fused readout: three small MXU dots (channel selection is baked into the
    # model-constant weights as zero rows) plus a broadcast bias add.
    acc = jnp.dot(x1_ref[...], w1_ref[...], preferred_element_type=jnp.float32)
    acc = acc + jnp.dot(x2_ref[...], w2_ref[...],
                        preferred_element_type=jnp.float32)
    acc = acc + jnp.dot(x3_ref[...], wfc_ref[...],
                        preferred_element_type=jnp.float32)
    out_ref[...] = acc + b_ref[...]


# -------------------- model-constant fused weight build -----------------------
def build_fused_weights(params):
    """Fold w_2d into the receptive fields per (full) feature channel — rows of
    unselected channels are zero, so channel selection costs nothing at
    runtime — scatter w_1d rows to their source channel positions, and pad
    the Nv axis to NV_PAD lanes.  Model-constant: computed ONCE."""
    weights_2d = {}
    off = 0
    for key in layers_2d:
        Ck = FEAT_CHANNELS_2D[key]
        Hk, Wk = res[res_id[key]]
        P = Hk * Wk
        rf = params["rfs"][res_id[key]].reshape(P, Nv)            # [P, Nv]
        wk = jnp.zeros((Ck, P, NV_PAD), jnp.float32)
        for j, c in enumerate(channels_2d[key]):
            wk = wk.at[c, :, :Nv].set(rf * params["w_2d"][off + j][None, :])
        weights_2d[key] = wk.reshape(Ck * P, NV_PAD)              # [Ck*P, NV_PAD]
        off += len(channels_2d[key])

    C_fc = FEAT_CHANNELS_1D["fc1"]
    wfc = jnp.zeros((C_fc, NV_PAD), jnp.float32)
    joff = 0
    for key in layers_1d:
        for j, c in enumerate(channels_1d[key]):
            wfc = wfc.at[c, :Nv].set(params["w_1d"][joff + j])
        joff += len(channels_1d[key])

    b_pad = jnp.zeros((1, NV_PAD), jnp.float32).at[0, :Nv].set(params["b"])
    # TODO(synk): at realistic fMRI voxel counts cast these model-constant
    # weights to bfloat16 (keep f32 accumulation in the kernel) to halve the
    # HBM weight-streaming bytes; requires relaxing the test tolerance.
    return weights_2d["conv1"], weights_2d["conv2"], wfc, b_pad


# ------------------------------- pallas wrapper --------------------------------
_K_TOTAL = K1 + K2 + KFC
_COST = pl.CostEstimate(
    flops=2 * B * _K_TOTAL * NV_PAD,
    transcendentals=0,
    bytes_accessed=4 * (B * _K_TOTAL + (_K_TOTAL + 1) * NV_PAD + B * NV_PAD),
)


@jax.jit
def encoder_forward_pallas(conv1, conv2, fc1, w1, w2, wfc, b_pad):
    # Per-call XLA glue is just two contiguous flattens (layout no-ops);
    # channel-select / concat / bias all happen inside the kernel.
    x1 = conv1.reshape(B, K1).astype(jnp.float32)   # [2, 512]
    x2 = conv2.reshape(B, K2).astype(jnp.float32)   # [2, 96]
    x3 = fc1.astype(jnp.float32)                    # [2, 5]
    out = pl.pallas_call(
        encoder_kernel,
        out_shape=jax.ShapeDtypeStruct((B, NV_PAD), jnp.float32),
        in_specs=[pl.BlockSpec(memory_space=pltpu.MemorySpace.VMEM)] * 7,
        out_specs=pl.BlockSpec(memory_space=pltpu.MemorySpace.VMEM),
        cost_estimate=_COST,
    )(x1, x2, x3, w1, w2, wfc, b_pad)
    return out[:, :Nv]
    # TODO(synk): at realistic fMRI voxel counts (Nv >> 128) tile the Nv axis:
    # grid=(Nv_pad // TILE_NV,) with dimension_semantics=("parallel",); size
    # TILE_NV per generation (multiple of 256 on v6e/v7x, 128 on v5e) so the
    # double-buffered weight tile fits the scoped VMEM limit (16 MiB v5e /
    # 32 MiB v6e / 32-of-64 MiB v7x), batch samples toward M=128-256, and
    # prefetch the weights in an earlier pallas_call (cross-call future) so
    # their HBM DMA hides behind the backbone.


# ---------------------------- reference (numpy, f64) ---------------------------
def encoder_forward_ref(features, params):
    f = {k: np.asarray(v, np.float64) for k, v in features.items()}
    rfs = [np.asarray(r, np.float64) for r in params["rfs"]]
    w_2d = np.asarray(params["w_2d"], np.float64)
    w_1d = np.asarray(params["w_1d"], np.float64)
    b = np.asarray(params["b"], np.float64)

    sig2 = []
    for key in layers_2d:
        sel = f[key][:, channels_2d[key]]                 # [B, ck, Hk, Wk]
        sel = sel.reshape(B, sel.shape[1], -1)            # flatten(-2, -1)
        rf = rfs[res_id[key]].reshape(-1, Nv)
        sig2.append(sel @ rf)                             # [B, ck, Nv]
    sigma_2d = (np.concatenate(sig2, axis=1) * w_2d[None, :, :]).sum(1)

    f1 = np.concatenate([f[key][:, channels_1d[key]] for key in layers_1d],
                        axis=1)                           # [B, N_1d]
    sigma_1d = (f1[:, :, None] * w_1d[None, :, :]).sum(1)
    return sigma_2d + sigma_1d + b


# ---------------------------------- main --------------------------------------
if __name__ == "__main__":
    key = jax.random.PRNGKey(0)
    k_params, k_x = jax.random.split(key)
    params = init_params(k_params)

    x = jax.random.normal(k_x, (B, Cin, H, W), jnp.float32)  # NCHW, like PyTorch
    features = backbone(x, params)
    features = jax.block_until_ready(features)

    # model-constant fused weights (rf * w_2d with zero rows for unselected
    # channels, scattered w_1d, padded bias) built ONCE
    w1, w2, wfc, b_pad = jax.block_until_ready(build_fused_weights(params))

    out = encoder_forward_pallas(features["conv1"], features["conv2"],
                                 features["fc1"], w1, w2, wfc, b_pad)
    out = jax.block_until_ready(out)

    ref = encoder_forward_ref(features, params)
    np.testing.assert_allclose(np.asarray(out), ref, rtol=1e-4, atol=1e-4)
    print("KERNEL_OK")
</pallas_src>

<mosaic_0001>
module attributes {stable_mosaic.version = 11 : i64} {
  func.func @encoder_kernel(%arg0: memref<2x512xf32, #tpu.memory_space<vmem>>, %arg1: memref<2x96xf32, #tpu.memory_space<vmem>>, %arg2: memref<2x5xf32, #tpu.memory_space<vmem>>, %arg3: memref<512x128xf32, #tpu.memory_space<vmem>>, %arg4: memref<96x128xf32, #tpu.memory_space<vmem>>, %arg5: memref<5x128xf32, #tpu.memory_space<vmem>>, %arg6: memref<1x128xf32, #tpu.memory_space<vmem>>, %arg7: memref<2x128xf32, #tpu.memory_space<vmem>>) attributes {dimension_semantics = [], scalar_prefetch = 0 : i64, scratch_operands = 0 : i64, tpu.core_type = #tpu.core_type<tc>} {
    %c0 = arith.constant 0 : index
    %c0_0 = arith.constant 0 : index
    %0 = vector.load %arg0[%c0, %c0_0] : memref<2x512xf32, #tpu.memory_space<vmem>>, vector<2x512xf32>
    %c0_1 = arith.constant 0 : index
    %c0_2 = arith.constant 0 : index
    %1 = vector.load %arg3[%c0_1, %c0_2] : memref<512x128xf32, #tpu.memory_space<vmem>>, vector<512x128xf32>
    %cst = arith.constant dense<0.000000e+00> : vector<2x128xf32>
    %2 = tpu.matmul %0, %1, %cst {dimension_numbers = #tpu.dot_dimension_numbers<[1], [0], [0], [1], [0, 0, 1, 1], [], []>} : vector<2x512xf32>, vector<512x128xf32>, vector<2x128xf32> -> vector<2x128xf32>
    %c0_3 = arith.constant 0 : index
    %c0_4 = arith.constant 0 : index
    %3 = vector.load %arg1[%c0_3, %c0_4] : memref<2x96xf32, #tpu.memory_space<vmem>>, vector<2x96xf32>
    %c0_5 = arith.constant 0 : index
    %c0_6 = arith.constant 0 : index
    %4 = vector.load %arg4[%c0_5, %c0_6] : memref<96x128xf32, #tpu.memory_space<vmem>>, vector<96x128xf32>
    %cst_7 = arith.constant dense<0.000000e+00> : vector<2x128xf32>
    %5 = tpu.matmul %3, %4, %cst_7 {dimension_numbers = #tpu.dot_dimension_numbers<[1], [0], [0], [1], [0, 0, 1, 1], [], []>} : vector<2x96xf32>, vector<96x128xf32>, vector<2x128xf32> -> vector<2x128xf32>
    %6 = arith.addf %2, %5 : vector<2x128xf32>
    %c0_8 = arith.constant 0 : index
    %c0_9 = arith.constant 0 : index
    %7 = vector.load %arg2[%c0_8, %c0_9] : memref<2x5xf32, #tpu.memory_space<vmem>>, vector<2x5xf32>
    %c0_10 = arith.constant 0 : index
    %c0_11 = arith.constant 0 : index
    %8 = vector.load %arg5[%c0_10, %c0_11] : memref<5x128xf32, #tpu.memory_space<vmem>>, vector<5x128xf32>
    %cst_12 = arith.constant dense<0.000000e+00> : vector<2x128xf32>
    %9 = tpu.matmul %7, %8, %cst_12 {dimension_numbers = #tpu.dot_dimension_numbers<[1], [0], [0], [1], [0, 0, 1, 1], [], []>} : vector<2x5xf32>, vector<5x128xf32>, vector<2x128xf32> -> vector<2x128xf32>
    %10 = arith.addf %6, %9 : vector<2x128xf32>
    %c0_13 = arith.constant 0 : index
    %c0_14 = arith.constant 0 : index
    %11 = vector.load %arg6[%c0_13, %c0_14] : memref<1x128xf32, #tpu.memory_space<vmem>>, vector<1x128xf32>
    %12 = vector.broadcast %11 : vector<1x128xf32> to vector<2x128xf32>
    %13 = arith.addf %10, %12 : vector<2x128xf32>
    %c0_15 = arith.constant 0 : index
    %c0_16 = arith.constant 0 : index
    %14 = vector.load %arg7[%c0_15, %c0_16] : memref<2x128xf32, #tpu.memory_space<vmem>>, vector<2x128xf32>
    tpu.vector_store %arg7[%c0_15, %c0_16], %13 {strides = array<i32>} : memref<2x128xf32, #tpu.memory_space<vmem>>, vector<2x128xf32>,
    return
  }
}

</mosaic_0001>

<bundles_post_ra>
// kernel: encoder_forward_pallas.1
= control target key start
LH: loop header
LB: loop body
LE: loop exit
PB: predicated region body
PF: predicated region fallthrough
CT: control target
= control target key end

     0   :  { %12 = vsyncpa [#allocation3], 0  ;;  %s759_s0 = inlined_call_operand.vmem [shape: f32[2,512], index: 0, kind: input, shape index: {}]   ;;  %s760_s1 = inlined_call_operand.vmem [shape: f32[2,96], index: 1, kind: input, shape index: {}]   ;;  %s761_s2 = inlined_call_operand.vmem [shape: f32[2,5], index: 2, kind: input, shape index: {}]   ;;  %s762_s3 = inlined_call_operand.hbm [shape: f32[512,128], index: 3, kind: input, shape index: {}]   ;;  %s763_s4 = inlined_call_operand.vmem [shape: f32[96,128], index: 4, kind: input, shape index: {}]   ;;  %s764_s5 = inlined_call_operand.vmem [shape: f32[5,128], index: 5, kind: input, shape index: {}]   ;;  %s765_s6 = inlined_call_operand.vmem [shape: f32[1,128], index: 6, kind: input, shape index: {}]   ;;  %s766_s7 = inlined_call_operand.hbm [shape: f32[2,128], index: 7, kind: output, shape index: {}]  }
   0x1   :  { %13 = vsyncpa [#allocation4], 0  ;;  %s633_s24 = smov [#allocation2]  }
   0x2   :  { %s25_s25 = sshll.u32 %s633_s24, 4  ;;  %s26_s25 = int_to_ptr.vmem [resolvable:$true] %s25_s25 }
   0x3   :  { %s597_s26 = scalar_lea.vmem %s26_s25, 8192  ;;  %p602_p1 = scmp.lt.s32.totalorder %s26_s25, %s26_s25 }
   0x4   :  { %p598_p0 = scmp.ne.s32.totalorder %s26_s25, %s597_s26  ;;  %p603_p2 = scmp.lt.s32.totalorder %s597_s26, %s597_s26 }
   0x6   :  { %p604_p3 = por %p603_p2, %p602_p1 }
   0x8   :  { %p605_p4 = pnand %p604_p3, %p598_p0 }
   0xa   :  { %608 = shalt.err (!%p605_p4)
}
   0xb   :  { %s634_s27 = smov 128   ;;  %s635_s28 = smov 8  }
   0xc   :  { %31 = dma.hbm_to_vmem [thread:$0]  %s762_s3, 8192, %s26_s25, [#allocation3], %s634_s27, %s634_s27, %s635_s28  }
   0xd   :  { %629 = dma.done.wait [#allocation3], 8192  }
   0xe   :  { %630 = vsyncadd [#allocation3], 4294959104  ;;  %v636_v0 = vmov 0.0   ;;  %vm637_vm0 = vmmov 0   ;;  %v118_v1 = vld [vmem:[%s763_s4 + $0x58] sm:$0xff]  ;;  %v117_v4 = vld [vmem:[%s763_s4 + $0x50] sm:$0xff]  ;;  %v198_v27 = vlaneseq }
   0xf   :  { %549 = vmatprep.subr.mxu0 %v636_v0  ;;  %573 = vmatprep.mubr.msk.f32.mxu0 %vm637_vm0, %v636_v0  ;;  %v73_v2 = vld [vmem:[#allocation2 + $0xf8] sm:$0xff]  ;;  %v72_v5 = vld [vmem:[#allocation2 + $0xf0] sm:$0xff]  ;;  %v116_v7 = vld [vmem:[%s763_s4 + $0x48] sm:$0xff]  ;;  %v638_v25 = vmov 1983009808   ;;  %vm119_vm1 = vcmask 785408  }
  0x10   :  { %v57_v3 = vld [vmem:[#allocation2 + $0x78] sm:$0xff]  ;;  %550 = vmatpush3.msra.mxu0 %v118_v1  ;;  %477 = vmatprep.subr.mxu1 %v73_v2  ;;  %v56_v6 = vld [vmem:[#allocation2 + $0x70] sm:$0xff]  ;;  %v71_v8 = vld [vmem:[#allocation2 + $0xe8] sm:$0xff]  ;;  %v196_v26 = vunpack.c.l.s4 %v638_v25  ;;  %v199_v35 = vshrl.u32 %v198_v27, 7  ;;  %vm361_vm2 = vcmask 1044480   ;;  %vm357_vm3 = vcmask 39936  }
  0x11   :  { %551 = vmatprep.subr.mxu0 %v636_v0  ;;  %478 = vmatpush3.msra.mxu1 %v57_v3  ;;  %v55_v9 = vld [vmem:[#allocation2 + $0x68] sm:$0xff]  ;;  %v115_v10 = vld [vmem:[%s763_s4 + $0x40] sm:$0xff]  ;;  %v114_v13 = vld [vmem:[%s763_s4 + $0x38] sm:$0xff]  ;;  %s639_s12 = smov [#allocation5]  }
  0x12   :  { %552 = vmatpush3.msra.mxu0 %v117_v4  ;;  %479 = vmatprep.subr.mxu1 %v72_v5  ;;  %v70_v11 = vld [vmem:[#allocation2 + $0xe0] sm:$0xff]  ;;  %v69_v14 = vld [vmem:[#allocation2 + $0xd8] sm:$0xff]  ;;  %v113_v16 = vld [vmem:[%s763_s4 + $0x30] sm:$0xff]  ;;  %v197_v34 = vunpack.c.0.s8 %v196_v26  ;;  %s451_s13 = sshll.u32 %s639_s12, 4  ;;  %s452_s13 = int_to_ptr.vmem [resolvable:$true] %s451_s13 }
  0x13   :  { %553 = vmatprep.subr.mxu0 %v636_v0  ;;  %480 = vmatpush3.msra.mxu1 %v56_v6  ;;  %v54_v12 = vld [vmem:[#allocation2 + $0x60] sm:$0xff]  ;;  %v53_v15 = vld [vmem:[#allocation2 + $0x58] sm:$0xff]  ;;  %v68_v17 = vld [vmem:[#allocation2 + $0xd0] sm:$0xff]  ;;  %s609_s14 = scalar_lea.vmem %s452_s13, 32  ;;  %p614_p6 = scmp.lt.s32.totalorder %s452_s13, %s452_s13 }
  0x14   :  { %554 = vmatpush3.msra.mxu0 %v116_v7  ;;  %481 = vmatprep.subr.mxu1 %v71_v8  ;;  %v52_v18 = vld [vmem:[#allocation2 + $0x50] sm:$0xff]  ;;  %v112_v19 = vld [vmem:[%s763_s4 + $0x28] sm:$0xff]  ;;  %v111_v22 = vld [vmem:[%s763_s4 + $0x20] sm:$0xff]  ;;  %v200_v43 = vsub.s32 %v197_v34, %v199_v35  ;;  %p610_p5 = scmp.ne.s32.totalorder %s452_s13, %s609_s14  ;;  %p615_p7 = scmp.lt.s32.totalorder %s609_s14, %s609_s14 }
  0x15   :  { %555 = vmatprep.subr.mxu0 %v636_v0  ;;  %482 = vmatpush3.msra.mxu1 %v55_v9  ;;  %v67_v20 = vld [vmem:[#allocation2 + $0xc8] sm:$0xff]  ;;  %v66_v23 = vld [vmem:[#allocation2 + $0xc0] sm:$0xff]  ;;  %v110_v28 = vld [vmem:[%s763_s4 + $0x18] sm:$0xff] }
  0x16   :  { %556 = vmatpush3.msra.mxu0 %v115_v10  ;;  %483 = vmatprep.subr.mxu1 %v70_v11  ;;  %v51_v21 = vld [vmem:[#allocation2 + $0x48] sm:$0xff]  ;;  %v50_v24 = vld [vmem:[#allocation2 + $0x40] sm:$0xff]  ;;  %v65_v29 = vld [vmem:[#allocation2 + $0xb8] sm:$0xff]  ;;  %p616_p8 = por %p615_p7, %p614_p6 }
  0x17   :  { %557 = vmatprep.subr.mxu0 %v636_v0  ;;  %484 = vmatpush3.msra.mxu1 %v54_v12  ;;  %v49_v30 = vld [vmem:[#allocation2 + $0x38] sm:$0xff]  ;;  %v109_v31 = vld [vmem:[%s763_s4 + $0x10] sm:$0xff]  ;;  %v108_v36 = vld [vmem:[%s763_s4 + $0x8] sm:$0xff] }
  0x18   :  { %558 = vmatpush3.msra.mxu0 %v114_v13  ;;  %485 = vmatprep.subr.mxu1 %v69_v14  ;;  %v64_v32 = vld [vmem:[#allocation2 + $0xb0] sm:$0xff]  ;;  %v63_v37 = vld [vmem:[#allocation2 + $0xa8] sm:$0xff]  ;;  %v107_v39 = vld [vmem:[%s763_s4] sm:$0xff]  ;;  %p617_p9 = pnand %p616_p8, %p610_p5 }
  0x19   :  { %559 = vmatprep.subr.mxu0 %v636_v0  ;;  %486 = vmatpush3.msra.mxu1 %v53_v15  ;;  %v48_v33 = vld [vmem:[#allocation2 + $0x30] sm:$0xff]  ;;  %v47_v38 = vld [vmem:[#allocation2 + $0x28] sm:$0xff]  ;;  %v62_v40 = vld [vmem:[#allocation2 + $0xa0] sm:$0xff] }
  0x1a   :  { %560 = vmatpush3.msra.mxu0 %v113_v16  ;;  %487 = vmatprep.subr.mxu1 %v68_v17  ;;  %v106_v41 = vld [vmem:[%s760_s1] sm:$0x3]  ;;  %v105_v44 = vld [vmem:[#allocation2 + $0x1f8] sm:$0xff]  ;;  %v104_v50 = vld [vmem:[#allocation2 + $0x1f0] sm:$0xff] }
  0x1b   :  { %561 = vmatprep.subr.mxu0 %v636_v0  ;;  %488 = vmatpush3.msra.mxu1 %v52_v18  ;;  %v46_v42 = vld [vmem:[#allocation2 + $0x20] sm:$0xff]  ;;  %v61_v45 = vld [vmem:[#allocation2 + $0x98] sm:$0xff]  ;;  %v60_v51 = vld [vmem:[#allocation2 + $0x90] sm:$0xff] }
  0x1c   :  { %562 = vmatpush3.msra.mxu0 %v112_v19  ;;  %489 = vmatprep.subr.mxu1 %v67_v20  ;;  %v41_v46 = vld [vmem:[%s759_s0] sm:$0xff]  ;;  %v89_v47 = vld [vmem:[#allocation2 + $0x178] sm:$0xff]  ;;  %v88_v52 = vld [vmem:[#allocation2 + $0x170] sm:$0xff] }
  0x1d   :  { %563 = vmatprep.subr.mxu0 %v636_v0  ;;  %490 = vmatpush3.msra.mxu1 %v51_v21  ;;  %v45_v48 = vld [vmem:[#allocation2 + $0x18] sm:$0xff]  ;;  %v194_v49 = vcombine.high %v41_v46, %v41_v46  ;;  %v44_v53 = vld [vmem:[#allocation2 + $0x10] sm:$0xff]  ;;  %v201_v54 = vrot.slane %v41_v46, %v200_v43  ;;  %v103_v55 = vld [vmem:[#allocation2 + $0x1e8] sm:$0xff] }
  0x1e   :  { %564 = vmatpush3.msra.mxu0 %v111_v22  ;;  %491 = vmatprep.subr.mxu1 %v66_v23  ;;  %v59_v56 = vld [vmem:[#allocation2 + $0x88] sm:$0xff]  ;;  %v102_v60 = vld [vmem:[#allocation2 + $0x1e0] sm:$0xff]  ;;  %v101_v2 = vld [vmem:[#allocation2 + $0x1d8] sm:$0xff] }
  0x1f   :  { %565 = vmatprep.subr.mxu0 %v636_v0  ;;  %492 = vmatpush3.msra.mxu1 %v50_v24  ;;  %v87_v57 = vld [vmem:[#allocation2 + $0x168] sm:$0xff]  ;;  %v739_v59 = vrot.slane %v194_v49, %v200_v43  ;;  %v58_v61 = vld [vmem:[#allocation2 + $0x80] sm:$0xff]  ;;  %v209_v1 = vcombine.high %v201_v54, %v201_v54  ;;  %v85_v3 = vld [vmem:[#allocation2 + $0x158] sm:$0xff] }
  0x20   :  { %566 = vmatpush3.msra.mxu0 %v110_v28  ;;  %493 = vmatprep.subr.mxu1 %v65_v29  ;;  %v43_v58 = vld [vmem:[#allocation2 + $0x8] sm:$0xff]  ;;  %v86_v62 = vld [vmem:[#allocation2 + $0x160] sm:$0xff]  ;;  %v100_v5 = vld [vmem:[#allocation2 + $0x1d0] sm:$0xff] }
  0x21   :  { %567 = vmatprep.subr.mxu0 %v636_v0  ;;  %494 = vmatpush3.msra.mxu1 %v49_v30  ;;  %v42_v63 = vld [vmem:[#allocation2] sm:$0xff]  ;;  %v210_v4 = vcombine.high %v739_v59, %v739_v59  ;;  %v84_v6 = vld [vmem:[#allocation2 + $0x150] sm:$0xff]  ;;  %v99_v7 = vld [vmem:[#allocation2 + $0x1c8] sm:$0xff] }
  0x22   :  { %568 = vmatpush3.msra.mxu0 %v109_v31  ;;  %495 = vmatprep.subr.mxu1 %v64_v32  ;;  %v356_v8 = vld [vmem:[%s764_s5] sm:$0x1f]  ;;  %v83_v9 = vld [vmem:[#allocation2 + $0x148] sm:$0xff]  ;;  %v97_v13 = vld [vmem:[#allocation2 + $0x1b8] sm:$0xff] }
  0x23   :  { %569 = vmatprep.subr.mxu0 %v636_v0  ;;  %496 = vmatpush3.msra.mxu1 %v48_v33  ;;  %v98_v10 = vld [vmem:[#allocation2 + $0x1c0] sm:$0xff]  ;;  %v81_v14 = vld [vmem:[#allocation2 + $0x138] sm:$0xff]  ;;  %v96_v15 = vld [vmem:[#allocation2 + $0x1b0] sm:$0xff] }
  0x24   :  { %570 = vmatpush3.msra.mxu0 %v108_v36  ;;  %497 = vmatprep.subr.mxu1 %v63_v37  ;;  %v355_v11 = vld [vmem:[%s761_s2] sm:$0x3]  ;;  %v80_v16 = vld [vmem:[#allocation2 + $0x130] sm:$0xff]  ;;  %v95_v17 = vld [vmem:[#allocation2 + $0x1a8] sm:$0xff] }
  0x25   :  { %571 = vmatprep.subr.mxu0 %v636_v0  ;;  %498 = vmatpush3.msra.mxu1 %v47_v38  ;;  %v82_v12 = vld [vmem:[#allocation2 + $0x140] sm:$0xff]  ;;  %v79_v18 = vld [vmem:[#allocation2 + $0x128] sm:$0xff]  ;;  %v93_v21 = vld [vmem:[#allocation2 + $0x198] sm:$0xff] }
  0x26   :  { %572 = vmatpush3.msra.mxu0 %v107_v39  ;;  %499 = vmatprep.subr.mxu1 %v62_v40  ;;  %v94_v19 = vld [vmem:[#allocation2 + $0x1a0] sm:$0xff]  ;;  %v77_v22 = vld [vmem:[#allocation2 + $0x118] sm:$0xff]  ;;  %v76_v23 = vld [vmem:[#allocation2 + $0x110] sm:$0xff] }
  0x27   :  { %574 = vmatmul.mubr.msk.f32.vlgmr.msra.gmra.mxu0 %vm119_vm1, %v106_v41  ;;  %500 = vmatpush3.msra.mxu1 %v46_v42  ;;  %v78_v20 = vld [vmem:[#allocation2 + $0x120] sm:$0xff]  ;;  %v91_v24 = vld [vmem:[#allocation2 + $0x188] sm:$0xff] }
  0x28   :  { %512 = vmatprep.subr.mxu0 %v105_v44  ;;  %501 = vmatprep.subr.mxu1 %v61_v45  ;;  %v75_v25 = vld [vmem:[#allocation2 + $0x108] sm:$0xff]  ;;  %v90_v26 = vld [vmem:[#allocation2 + $0x180] sm:$0xff] }
  0x29   :  { %513 = vmatpush3.msra.mxu0 %v89_v47  ;;  %502 = vmatpush3.msra.mxu1 %v45_v48  ;;  %v74_v27 = vld [vmem:[#allocation2 + $0x100] sm:$0xff] }
  0x2a   :  { %514 = vmatprep.subr.mxu0 %v104_v50  ;;  %503 = vmatprep.subr.mxu1 %v60_v51  ;;  %v463_v40 = vld [vmem:[%s765_s6] ss:$0 sm:$0xff] }
  0x2b   :  { %515 = vmatpush3.msra.mxu0 %v88_v52  ;;  %504 = vmatpush3.msra.mxu1 %v44_v53 }
  0x2c   :  { %516 = vmatprep.subr.mxu0 %v103_v55  ;;  %505 = vmatprep.subr.mxu1 %v59_v56 }
  0x2d   :  { %517 = vmatpush3.msra.mxu0 %v87_v57  ;;  %506 = vmatpush3.msra.mxu1 %v43_v58 }
  0x2e   :  { %518 = vmatprep.subr.mxu0 %v102_v60  ;;  %507 = vmatprep.subr.mxu1 %v58_v61 }
  0x2f   :  { %519 = vmatpush3.msra.mxu0 %v86_v62  ;;  %508 = vmatpush3.msra.mxu1 %v42_v63 }
  0x30   :  { %279 = vmatprep.mubr.f32.mxu1 %v209_v1  ;;  %520 = vmatprep.subr.mxu0 %v101_v2 }
  0x31   :  { %280 = vmatmul.mubr.f32.vlgmr.msra.gmra.mxu1 %v201_v54  ;;  %521 = vmatpush3.msra.mxu0 %v85_v3 }
  0x32   :  { %522 = vmatprep.subr.mxu0 %v100_v5  ;;  %349 = vmatprep.mubr.f32.mxu0 %v210_v4 }
  0x33   :  { %523 = vmatpush3.msra.mxu0 %v84_v6  ;;  %576 = vmatprep.subr.mxu1 %v636_v0 }
  0x34   :  { %524 = vmatprep.subr.mxu0 %v99_v7  ;;  %577 = vmatpush3.msk.msra.mxu1 %vm361_vm2, %v356_v8 }
  0x35   :  { %525 = vmatpush3.msra.mxu0 %v83_v9  ;;  %578 = vmatprep.mubr.msk.f32.mxu1 %vm637_vm0, %v636_v0  ;;  %v92_v0 = vld [vmem:[#allocation2 + $0x190] sm:$0xff] }
  0x36   :  { %526 = vmatprep.subr.mxu0 %v98_v10  ;;  %579 = vmatmul.mubr.msk.f32.vlgmr.msra.gmra.mxu1 %vm357_vm3, %v355_v11 }
  0x37   :  { %527 = vmatpush3.msra.mxu0 %v82_v12 }
  0x38   :  { %528 = vmatprep.subr.mxu0 %v97_v13 }
  0x39   :  { %529 = vmatpush3.msra.mxu0 %v81_v14 }
  0x3a   :  { %530 = vmatprep.subr.mxu0 %v96_v15 }
  0x3b   :  { %531 = vmatpush3.msra.mxu0 %v80_v16 }
  0x3c   :  { %532 = vmatprep.subr.mxu0 %v95_v17 }
  0x3d   :  { %533 = vmatpush3.msra.mxu0 %v79_v18 }
  0x3e   :  { %534 = vmatprep.subr.mxu0 %v94_v19 }
  0x3f   :  { %535 = vmatpush3.msra.mxu0 %v78_v20 }
  0x40   :  { %536 = vmatprep.subr.mxu0 %v93_v21 }
  0x41   :  { %537 = vmatpush3.msra.mxu0 %v77_v22 }
  0x42   :  { %538 = vmatprep.subr.mxu0 %v92_v0 }
  0x43   :  { %539 = vmatpush3.msra.mxu0 %v76_v23 }
  0x44   :  { %540 = vmatprep.subr.mxu0 %v91_v24 }
  0x45   :  { %541 = vmatpush3.msra.mxu0 %v75_v25 }
  0x46   :  { %542 = vmatprep.subr.mxu0 %v90_v26 }
  0x47   :  { %543 = vmatpush3.msra.mxu0 %v74_v27 }
  0x48   :  { %350 = vmatmul.mubr.f32.vlgmr.msra.gmra.mxu0 %v739_v59 }
  0xe7   :  { %v189_v28 = vpop.f32.mrf.mxu0 }
  0xe9   :  { %v575_v29 = vpop.f32.mrf.mxu0 }
  0xf1   :  { %v509_v30 = vpop.f32.mrf.mxu1 }
  0xf3   :  { %v510_v31 = vpop.f32.mrf.mxu1 }
  0xf4   :  { %v511_v34 = vadd.f32 %v510_v31, %v509_v30 }
  0xf6   :  { %v431_v32 = vpop.f32.mrf.mxu1  ;;  %v282_v37 = vadd.f32 %v511_v34, %v189_v28 }
  0xf8   :  { %v580_v33 = vpop.f32.mrf.mxu1 }
 0x108   :  { %v544_v35 = vpop.f32.mrf.mxu0 }
 0x10a   :  { %v545_v36 = vpop.f32.mrf.mxu0 }
 0x10b   :  { %v546_v38 = vadd.f32 %v545_v36, %v544_v35 }
 0x10d   :  { %v352_v39 = vadd.f32 %v546_v38, %v282_v37 }
 0x10f   :  { %v435_v41 = vadd.f32 %v431_v32, %v352_v39 }
 0x111   :  { %v443_v42 = vadd.f32 %v463_v40, %v435_v41 }
 0x113   :  { %444 = vst [vmem:[#allocation5] sm:$0x3] %v443_v42 }
 0x114   :  { %620 = shalt.err (!%p617_p9)
}
 0x115   :  { %454 = dma.vmem_to_hbm [thread:$0]  %s452_s13, 32, %s766_s7, [#allocation4]  }
 0x116   :  { %631 = dma.done.wait [#allocation4], 32  }
 0x117   :  { %632 = vsyncadd [#allocation4], 4294967264 }
 0x118   :  { %458 = vsyncpa [#allocation3], 1 }
 0x119   :  { %459 = vsyncpa [#allocation4], 1 }

</bundles_post_ra>
